<compile_context>
chip_gen: v7x
topology: tpu7x:2x2x1
jax: 0.10.0
libtpu: 0.0.40
codegen_flags: <defaults>
</compile_context>

<pallas_src>
import jax
import jax.numpy as jnp
from jax.experimental import pallas as pl
from jax.experimental.pallas import tpu as pltpu


def _channel_w_kernel(w_ref, x_ref, o_ref):
    # w_ref: (TM, 1) per-row channel weights; x_ref / o_ref: (TM, TW) lane-dense tile.
    o_ref[...] = x_ref[...] * w_ref[...]


_MIB = 1024 * 1024
# Below this total size, pallas_call dispatch + pipeline prologue (several us)
# dwarfs the sub-us HBM traffic; plain XLA broadcast-multiply wins everywhere.
_SMALL_TENSOR_BYTES = 1 * _MIB


def _chip_tuning():
    """Best-effort hardware probe -> (target_tile_bytes, likely_two_tensorcores)."""
    vmem_cap = None
    try:
        info = pltpu.get_tpu_info()
        vmem_cap = getattr(info, "vmem_capacity_bytes", None)
    except Exception:
        vmem_cap = None
    if vmem_cap is not None and vmem_cap <= 80 * _MIB:
        # v7x-class: 64 MiB VMEM/TC, ~3.2 TB/s HBM -> bigger tiles amortize the
        # ~0.35 us per-grid-step overhead; 2 TensorCores per chip want >= 2 blocks.
        return 8 * _MIB, True
    # v5e / v6e (128 MiB physical VMEM, single TC): 4 MiB tiles sit on the
    # measured ~85%-of-roofline plateau and, with an explicit vmem limit, are
    # safe on both generations.
    return 4 * _MIB, False


def channel_w_forward(x, w1, *, force_pallas=False, tile_bytes_override=None):
    """x: (N, C, H, W), w1: (1, C, 1, 1) -> (N, C, H, W) == w1 * x."""
    N, C, H, W = x.shape
    assert w1.shape == (1, C, 1, 1)

    # Pin the weight to x's dtype so in-kernel math matches the wrapper path.
    # TODO(synk): for mixed dtypes (f32 weight * bf16 activation) PyTorch promotes
    # to f32; here the multiply happens in x.dtype.  Identical when both are f32.
    w1 = w1.astype(x.dtype)

    itemsize = jnp.dtype(x.dtype).itemsize
    total_bytes = x.size * itemsize

    if not force_pallas and total_bytes < _SMALL_TENSOR_BYTES:
        # Small-tensor fast path: skip the kernel entirely.
        return w1 * x

    rows, cols = N * C, H * W

    # Lane-dense 2D views (free reshapes for row-major NCHW).
    x2 = x.reshape(rows, cols)
    # Per-row weight column: row r = (n, c) gets w1[0, c, 0, 0].
    w_rows = jnp.broadcast_to(w1.reshape(1, C, 1), (N, C, 1)).reshape(rows, 1)

    target_tile_bytes, two_cores = _chip_tuning()
    if tile_bytes_override is not None:
        target_tile_bytes = int(tile_bytes_override)

    # Packed-sublane row granularity: 8 rows at 32-bit, 16 at 16-bit, 32 at 8-bit.
    # Keeps output stores unmasked and avoids relayout for bf16 / int8 activations.
    sub_mult = max(8, 32 // max(itemsize, 1))

    # ---- Tile selection -----------------------------------------------------
    row_bytes = cols * itemsize
    if sub_mult * row_bytes > target_tile_bytes:
        # Even a minimal-height row block is too big: split the column axis into
        # 128-lane multiples.  cols does NOT need to be 128-divisible -- the
        # ragged final column block is masked by Pallas; only the block shape
        # itself must be 128-aligned (or full extent).
        tw = (target_tile_bytes // (sub_mult * itemsize)) // 128 * 128
        tw = max(128, min(tw, cols))
        tm = rows if rows <= sub_mult else sub_mult
    else:
        tw = cols  # full extent -> unmasked, lane-dense stores
        tm = target_tile_bytes // max(tw * itemsize, 1)
        if tm >= rows:
            tm = rows
            # v7x: 2 TensorCores per chip -- give the 'parallel' row axis >= 2
            # blocks so both cores stream concurrently on mid-sized tensors.
            if two_cores and rows >= 2 * sub_mult:
                tm = max(sub_mult, ((rows // 2) // sub_mult) * sub_mult)
        else:
            tm = max(sub_mult, (tm // sub_mult) * sub_mult)

    grid = (pl.cdiv(rows, tm), pl.cdiv(cols, tw))

    # Explicit VMEM budget: double-buffered input tile + output tile (+ tiny
    # weight column + slack).  Self-documenting and keeps larger v6e/v7x tiles
    # safe regardless of the scoped default.
    tile_bytes = tm * tw * itemsize
    vmem_limit = max(16 * _MIB, min(96 * _MIB, 4 * tile_bytes + 4 * _MIB))

    out2 = pl.pallas_call(
        _channel_w_kernel,
        out_shape=jax.ShapeDtypeStruct((rows, cols), x.dtype),
        grid=grid,
        in_specs=[
            # Per-row weight column: one small VMEM tile per row block.
            pl.BlockSpec((tm, 1), lambda i, j: (i, 0)),
            # Lane-dense data tile.
            pl.BlockSpec((tm, tw), lambda i, j: (i, j)),
        ],
        out_specs=pl.BlockSpec((tm, tw), lambda i, j: (i, j)),
        compiler_params=pltpu.CompilerParams(
            dimension_semantics=("parallel", "parallel"),
            vmem_limit_bytes=vmem_limit,
        ),
    )(w_rows, x2)

    return out2.reshape(N, C, H, W)
    # TODO(synk): in a real model, prefer fusing this per-channel scale into the
    # adjacent producer/consumer kernel instead of paying a full read+write of x.


if __name__ == "__main__":
    # Small shapes consistent with the module: batch=2, channels=4, spatial=16.
    N, C, H, W = 2, 4, 16, 16

    key = jax.random.PRNGKey(0)
    kx, kw = jax.random.split(key)

    x = jax.random.normal(kx, (N, C, H, W), dtype=jnp.float32)
    # Mirrors torch.rand(1, out_ch, 1, 1) * 0.001 (deterministic synthetic init).
    w1 = jax.random.uniform(kw, (1, C, 1, 1), dtype=jnp.float32) * 0.001

    ref = w1 * x  # plain-JAX broadcast semantics (matches PyTorch)

    # 1) Force the Pallas kernel path on the demo shape (single-block grid).
    out_kernel = jax.block_until_ready(channel_w_forward(x, w1, force_pallas=True))
    assert out_kernel.shape == ref.shape
    assert jnp.allclose(out_kernel, ref, atol=1e-6, rtol=1e-6)

    # 2) Exercise the multi-block, column-split tiling path with a tiny tile target.
    out_tiled = jax.block_until_ready(
        channel_w_forward(x, w1, force_pallas=True, tile_bytes_override=4096)
    )
    assert jnp.allclose(out_tiled, ref, atol=1e-6, rtol=1e-6)

    # 3) Auto path: this shape is tiny, so it takes the plain-JAX fast path.
    out_auto = jax.block_until_ready(channel_w_forward(x, w1))
    assert jnp.allclose(out_auto, ref, atol=1e-6, rtol=1e-6)

    print("KERNEL_OK")
</pallas_src>

<mosaic_0001>
module attributes {stable_mosaic.version = 11 : i64} {
  func.func @_channel_w_kernel(%arg0: i32, %arg1: i32, %arg2: memref<8x1xf32, #tpu.memory_space<vmem>>, %arg3: memref<8x256xf32, #tpu.memory_space<vmem>>, %arg4: memref<8x256xf32, #tpu.memory_space<vmem>>) attributes {dimension_semantics = [#tpu.dimension_semantics<parallel>, #tpu.dimension_semantics<parallel>], iteration_bounds = array<i64: 1, 1>, scalar_prefetch = 0 : i64, scratch_operands = 0 : i64, tpu.core_type = #tpu.core_type<tc>, window_params = [{transform_indices = @transform_0, window_bounds = array<i64: 8, 1>}, {transform_indices = @transform_1, window_bounds = array<i64: 8, 256>}, {transform_indices = @transform_2, window_bounds = array<i64: 8, 256>}]} {
    %c0 = arith.constant 0 : index
    %c0_0 = arith.constant 0 : index
    %0 = vector.load %arg3[%c0, %c0_0] : memref<8x256xf32, #tpu.memory_space<vmem>>, vector<8x256xf32>
    %c0_1 = arith.constant 0 : index
    %c0_2 = arith.constant 0 : index
    %1 = vector.load %arg2[%c0_1, %c0_2] : memref<8x1xf32, #tpu.memory_space<vmem>>, vector<8x1xf32>
    %2 = vector.broadcast %1 : vector<8x1xf32> to vector<8x256xf32>
    %3 = arith.mulf %0, %2 : vector<8x256xf32>
    %c0_3 = arith.constant 0 : index
    %c0_4 = arith.constant 0 : index
    %4 = vector.load %arg4[%c0_3, %c0_4] : memref<8x256xf32, #tpu.memory_space<vmem>>, vector<8x256xf32>
    tpu.vector_store %arg4[%c0_3, %c0_4], %3 {strides = array<i32>} : memref<8x256xf32, #tpu.memory_space<vmem>>, vector<8x256xf32>,
    return
  }
  func.func @transform_0(%arg0: i32, %arg1: i32) -> (i32, i32) {
    %c0_i32 = arith.constant 0 : i32
    %c0_i32_0 = arith.constant 0 : i32
    return %arg0, %c0_i32 : i32, i32
  }
  func.func @transform_1(%arg0: i32, %arg1: i32) -> (i32, i32) {
    %c0_i32 = arith.constant 0 : i32
    return %arg0, %arg1 : i32, i32
  }
  func.func @transform_2(%arg0: i32, %arg1: i32) -> (i32, i32) {
    %c0_i32 = arith.constant 0 : i32
    return %arg0, %arg1 : i32, i32
  }
}

</mosaic_0001>

<bundles_post_ra>
// kernel: tpu_custom_call.1
= control target key start
LH: loop header
LB: loop body
LE: loop exit
PB: predicated region body
PF: predicated region fallthrough
CT: control target
= control target key end

     0   :  { %7 = vsyncpa [#allocation3], 0  ;;  %s148_s0 = inlined_call_operand.vmem [shape: f32[8,1], index: 0, kind: input, shape index: {}]   ;;  %s149_s1 = inlined_call_operand.hbm [shape: f32[8,256], index: 1, kind: input, shape index: {}]   ;;  %s150_s2 = inlined_call_operand.hbm [shape: f32[8,256], index: 2, kind: output, shape index: {}]  }
   0x1   :  { %8 = vsyncpa [#allocation4], 0  ;;  %s103_s9 = smov [#allocation2]   ;;  %s55_s13 = scalar_lea.hbm %s149_s1, 256 }
   0x2   :  { %s17_s10 = sshll.u32 %s103_s9, 4  ;;  %p56_p0 = scmp.ne.s32.totalorder %s149_s1, %s55_s13  ;;  %s18_s10 = int_to_ptr.vmem [resolvable:$true] %s17_s10 }
   0x3   :  { %p59_p1 = scmp.lt.u32.totalorder %s55_s13, %s149_s1 }
   0x5   :  { %p61_p2 = pnand %p59_p1, %p56_p0 }
   0x7   :  { %64 = shalt.err (!%p61_p2)
}
   0x8   :  { %s65_s18 = scalar_lea.vmem %s18_s10, 256  ;;  %p70_p4 = scmp.lt.s32.totalorder %s18_s10, %s18_s10 }
   0x9   :  { %p66_p3 = scmp.ne.s32.totalorder %s18_s10, %s65_s18  ;;  %p71_p5 = scmp.lt.s32.totalorder %s65_s18, %s65_s18 }
   0xb   :  { %p72_p6 = por %p71_p5, %p70_p4 }
   0xd   :  { %p73_p7 = pnand %p72_p6, %p66_p3 }
   0xf   :  { %76 = shalt.err (!%p73_p7)
}
  0x10   :  { %20 = dma.hbm_to_vmem [thread:$0]  %s149_s1, 256, %s18_s10, [#allocation3]  }
  0x11   :  { %99 = dma.done.wait [#allocation3], 256  }
  0x12   :  { %100 = vsyncadd [#allocation3], 4294967040  ;;  %v104_v0 = vmov 0   ;;  %v26_v1 = vld [vmem:[%s148_s0] sm:$0xff]  ;;  %v25_v3 = vld [vmem:[#allocation2 + $0x8] sm:$0xff]  ;;  %s105_s23 = smov [#allocation5]  }
  0x13   :  { %54 = vset.pattern.permute.xlu0 %v104_v0  ;;  %v24_v2 = vld [vmem:[#allocation2] sm:$0xff]  ;;  %s42_s24 = sshll.u32 %s105_s23, 4  ;;  %s43_s24 = int_to_ptr.vmem [resolvable:$true] %s42_s24 }
  0x14   :  { %29 = vperm.xlu0 %54, %v26_v1   ;;  %s77_s1 = scalar_lea.vmem %s43_s24, 256  ;;  %p82_p9 = scmp.lt.s32.totalorder %s43_s24, %s43_s24 }
  0x15   :  { %p78_p8 = scmp.ne.s32.totalorder %s43_s24, %s77_s1  ;;  %p83_p10 = scmp.lt.s32.totalorder %s77_s1, %s77_s1 }
  0x17   :  { %p84_p11 = por %p83_p10, %p82_p9 }
  0x19   :  { %p85_p12 = pnand %p84_p11, %p78_p8 }
  0x93   :  { %v30_v4 = vpop.permute.xlu0 %29 }
  0x94   :  { %v32_v5 = vmul.f32 %v30_v4, %v24_v2  ;;  %v33_v6 = vmul.f32 %v30_v4, %v25_v3 }
  0x96   :  { %34 = vst [vmem:[#allocation5] sm:$0xff] %v32_v5  ;;  %35 = vst [vmem:[#allocation5 + $0x8] sm:$0xff] %v33_v6 }
  0x97   :  { %88 = shalt.err (!%p85_p12)
}
  0x98   :  { %s89_s26 = scalar_lea.hbm %s150_s2, 256 }
  0x99   :  { %p90_p13 = scmp.ne.s32.totalorder %s150_s2, %s89_s26  ;;  %p93_p0 = scmp.lt.u32.totalorder %s89_s26, %s150_s2 }
  0x9b   :  { %p95_p1 = pnand %p93_p0, %p90_p13 }
  0x9d   :  { %98 = shalt.err (!%p95_p1)
}
  0x9e   :  { %45 = dma.vmem_to_hbm [thread:$0]  %s43_s24, 256, %s150_s2, [#allocation4]  }
  0x9f   :  { %101 = dma.done.wait [#allocation4], 256  }
  0xa0   :  { %102 = vsyncadd [#allocation4], 4294967040 }
  0xa1   :  { %49 = vsyncpa [#allocation3], 1 }
  0xa2   :  { %50 = vsyncpa [#allocation4], 1 }

</bundles_post_ra>
